<compile_context>
chip_gen: v6e
topology: v6e:2x2x1
jax: 0.10.0
libtpu: 0.0.40
codegen_flags: <defaults>
</compile_context>

<pallas_src>
import jax
import jax.numpy as jnp
from jax import lax
from jax.experimental import pallas as pl
from jax.experimental.pallas import tpu as pltpu


# ---------------------------------------------------------------------------
# Single-step kernel: new_h = tanh(x @ W^T + b + h)   (exact MyCell.forward)
# ---------------------------------------------------------------------------
def mycell_kernel(x_ref, wt_ref, b_ref, h_ref, o_ref):
    B, in_feat = x_ref.shape
    out_feat = wt_ref.shape[1]
    x = x_ref[...].astype(jnp.float32)        # (B, IN)
    wt = wt_ref[...].astype(jnp.float32)      # (IN, OUT)  -- pre-transposed
    # Hoisted W^T row broadcasts (done once; kernel body runs once anyway).
    w_rows = [jnp.broadcast_to(wt[k:k + 1, :], (B, out_feat))
              for k in range(in_feat)]
    acc = b_ref[...].astype(jnp.float32) + h_ref[...].astype(jnp.float32)
    for k in range(in_feat):                  # IN=4: unrolled VPU FMAs, no MXU
        acc = acc + x[:, k:k + 1] * w_rows[k]
    o_ref[...] = jnp.tanh(acc).astype(o_ref.dtype)


def mycell_forward(x, h, weight, bias):
    """new_h = tanh(x @ weight.T + bias + h); returns (new_h, new_h)."""
    B, _ = x.shape
    out_feat = weight.shape[0]
    wt = weight.T                              # one-time transpose outside kernel
    bias2d = bias.reshape(1, out_feat)

    vmem = pl.BlockSpec(memory_space=pltpu.MemorySpace.VMEM)
    new_h = pl.pallas_call(
        mycell_kernel,
        out_shape=jax.ShapeDtypeStruct((B, out_feat), x.dtype),
        in_specs=[vmem, vmem, vmem, vmem],
        out_specs=vmem,
    )(x, wt, bias2d, h)
    return new_h, new_h


# ---------------------------------------------------------------------------
# Fused recurrent variant: T applications of the cell in ONE pallas_call,
# single grid point (no per-step pipeline overhead, no per-step DMAs).
#   hs[t] = tanh(xs[t] @ W^T + b + hs[t-1]),   hs[-1] = h0
# ---------------------------------------------------------------------------
def mycell_seq_kernel(xs_ref, wt_ref, b_ref, h0_ref, hs_ref):
    T, B, in_feat = xs_ref.shape
    out_feat = wt_ref.shape[1]

    wt = wt_ref[...].astype(jnp.float32)       # (IN, OUT), resident in VMEM
    b = b_ref[...].astype(jnp.float32)         # (1, OUT)
    # Hoist loop-invariant W^T row broadcasts out of the time loop.
    w_rows = [jnp.broadcast_to(wt[k:k + 1, :], (B, out_feat))
              for k in range(in_feat)]

    def body(t, h):                            # h carried in vregs
        x = xs_ref[t].astype(jnp.float32)      # (B, IN)
        acc = b + h                            # (B, OUT)
        for k in range(in_feat):               # 4 unrolled VPU FMAs
            acc = acc + x[:, k:k + 1] * w_rows[k]
        new_h = jnp.tanh(acc)                  # EUP
        hs_ref[t] = new_h.astype(hs_ref.dtype)
        return new_h

    lax.fori_loop(0, T, body, h0_ref[...].astype(jnp.float32), unroll=True)


def mycell_recurrent(xs, h0, weight, bias):
    """Run MyCell over a whole sequence in a single kernel launch."""
    T, B, in_feat = xs.shape
    out_feat = weight.shape[0]
    wt = weight.T
    bias2d = bias.reshape(1, out_feat)

    vmem = pl.BlockSpec(memory_space=pltpu.MemorySpace.VMEM)
    hs = pl.pallas_call(
        mycell_seq_kernel,
        out_shape=jax.ShapeDtypeStruct((T, B, out_feat), xs.dtype),
        in_specs=[vmem, vmem, vmem, vmem],     # whole arrays resident in VMEM
        out_specs=vmem,
    )(xs, wt, bias2d, h0)
    return hs


if __name__ == "__main__":
    key = jax.random.PRNGKey(0)
    k_x, k_h, k_w, k_b, k_seq = jax.random.split(key, 5)

    B, IN, OUT, T = 8, 4, 4, 16  # Linear(4, 4); small batch; short sequence

    x = jax.random.normal(k_x, (B, IN), dtype=jnp.float32)
    h = jax.random.normal(k_h, (B, OUT), dtype=jnp.float32)

    # Deterministic params (mimics nn.Linear's uniform(-1/sqrt(in), 1/sqrt(in)))
    bound = 1.0 / jnp.sqrt(jnp.float32(IN))
    weight = jax.random.uniform(k_w, (OUT, IN), dtype=jnp.float32,
                                minval=-bound, maxval=bound)
    bias = jax.random.uniform(k_b, (OUT,), dtype=jnp.float32,
                              minval=-bound, maxval=bound)

    # ---- single step: exact MyCell.forward semantics ----
    new_h, new_h2 = mycell_forward(x, h, weight, bias)
    jax.block_until_ready(new_h)
    jax.block_until_ready(new_h2)
    ref = jnp.tanh(x @ weight.T + bias + h)
    assert jnp.allclose(new_h, ref, atol=1e-5, rtol=1e-5)
    assert jnp.array_equal(new_h, new_h2)

    # ---- fused recurrent loop: T cell applications in ONE pallas_call ----
    xs = jax.random.normal(k_seq, (T, B, IN), dtype=jnp.float32)
    hs = mycell_recurrent(xs, h, weight, bias)
    jax.block_until_ready(hs)

    def step(hc, xt):
        hn = jnp.tanh(xt @ weight.T + bias + hc)
        return hn, hn

    _, hs_ref = jax.lax.scan(step, h, xs)
    assert jnp.allclose(hs, hs_ref, atol=1e-5, rtol=1e-5)

    print("KERNEL_OK")
</pallas_src>

<mosaic_0001>
module attributes {stable_mosaic.version = 11 : i64} {
  func.func @mycell_kernel(%arg0: memref<8x4xf32, #tpu.memory_space<vmem>>, %arg1: memref<4x4xf32, #tpu.memory_space<vmem>>, %arg2: memref<1x4xf32, #tpu.memory_space<vmem>>, %arg3: memref<8x4xf32, #tpu.memory_space<vmem>>, %arg4: memref<8x4xf32, #tpu.memory_space<vmem>>) attributes {dimension_semantics = [], scalar_prefetch = 0 : i64, scratch_operands = 0 : i64, tpu.core_type = #tpu.core_type<tc>} {
    %c0 = arith.constant 0 : index
    %c0_0 = arith.constant 0 : index
    %0 = vector.load %arg0[%c0, %c0_0] : memref<8x4xf32, #tpu.memory_space<vmem>>, vector<8x4xf32>
    %c0_1 = arith.constant 0 : index
    %c0_2 = arith.constant 0 : index
    %1 = vector.load %arg1[%c0_1, %c0_2] : memref<4x4xf32, #tpu.memory_space<vmem>>, vector<4x4xf32>
    %2 = vector.extract_strided_slice %1 {offsets = [0, 0], sizes = [1, 4], strides = [1, 1]} : vector<4x4xf32> to vector<1x4xf32>
    %3 = vector.shape_cast %2 : vector<1x4xf32> to vector<1x4xf32>
    %4 = vector.broadcast %3 : vector<1x4xf32> to vector<8x4xf32>
    %5 = vector.extract_strided_slice %1 {offsets = [1, 0], sizes = [1, 4], strides = [1, 1]} : vector<4x4xf32> to vector<1x4xf32>
    %6 = vector.shape_cast %5 : vector<1x4xf32> to vector<1x4xf32>
    %7 = vector.broadcast %6 : vector<1x4xf32> to vector<8x4xf32>
    %8 = vector.extract_strided_slice %1 {offsets = [2, 0], sizes = [1, 4], strides = [1, 1]} : vector<4x4xf32> to vector<1x4xf32>
    %9 = vector.shape_cast %8 : vector<1x4xf32> to vector<1x4xf32>
    %10 = vector.broadcast %9 : vector<1x4xf32> to vector<8x4xf32>
    %11 = vector.extract_strided_slice %1 {offsets = [3, 0], sizes = [1, 4], strides = [1, 1]} : vector<4x4xf32> to vector<1x4xf32>
    %12 = vector.shape_cast %11 : vector<1x4xf32> to vector<1x4xf32>
    %13 = vector.broadcast %12 : vector<1x4xf32> to vector<8x4xf32>
    %c0_3 = arith.constant 0 : index
    %c0_4 = arith.constant 0 : index
    %14 = vector.load %arg2[%c0_3, %c0_4] : memref<1x4xf32, #tpu.memory_space<vmem>>, vector<1x4xf32>
    %c0_5 = arith.constant 0 : index
    %c0_6 = arith.constant 0 : index
    %15 = vector.load %arg3[%c0_5, %c0_6] : memref<8x4xf32, #tpu.memory_space<vmem>>, vector<8x4xf32>
    %16 = vector.broadcast %14 : vector<1x4xf32> to vector<8x4xf32>
    %17 = arith.addf %16, %15 : vector<8x4xf32>
    %18 = vector.extract_strided_slice %0 {offsets = [0, 0], sizes = [8, 1], strides = [1, 1]} : vector<8x4xf32> to vector<8x1xf32>
    %19 = vector.broadcast %18 : vector<8x1xf32> to vector<8x4xf32>
    %20 = arith.mulf %19, %4 : vector<8x4xf32>
    %21 = arith.addf %17, %20 : vector<8x4xf32>
    %22 = vector.extract_strided_slice %0 {offsets = [0, 1], sizes = [8, 1], strides = [1, 1]} : vector<8x4xf32> to vector<8x1xf32>
    %23 = vector.broadcast %22 : vector<8x1xf32> to vector<8x4xf32>
    %24 = arith.mulf %23, %7 : vector<8x4xf32>
    %25 = arith.addf %21, %24 : vector<8x4xf32>
    %26 = vector.extract_strided_slice %0 {offsets = [0, 2], sizes = [8, 1], strides = [1, 1]} : vector<8x4xf32> to vector<8x1xf32>
    %27 = vector.broadcast %26 : vector<8x1xf32> to vector<8x4xf32>
    %28 = arith.mulf %27, %10 : vector<8x4xf32>
    %29 = arith.addf %25, %28 : vector<8x4xf32>
    %30 = vector.extract_strided_slice %0 {offsets = [0, 3], sizes = [8, 1], strides = [1, 1]} : vector<8x4xf32> to vector<8x1xf32>
    %31 = vector.broadcast %30 : vector<8x1xf32> to vector<8x4xf32>
    %32 = arith.mulf %31, %13 : vector<8x4xf32>
    %33 = arith.addf %29, %32 : vector<8x4xf32>
    %34 = math.tanh %33 : vector<8x4xf32>
    %c0_7 = arith.constant 0 : index
    %c0_8 = arith.constant 0 : index
    %35 = vector.load %arg4[%c0_7, %c0_8] : memref<8x4xf32, #tpu.memory_space<vmem>>, vector<8x4xf32>
    tpu.vector_store %arg4[%c0_7, %c0_8], %34 {strides = array<i32>} : memref<8x4xf32, #tpu.memory_space<vmem>>, vector<8x4xf32>,
    return
  }
}

</mosaic_0001>

<bundles_post_ra>
// kernel: tpu_custom_call.1
= control target key start
LH: loop header
LB: loop body
LE: loop exit
PB: predicated region body
PF: predicated region fallthrough
CT: control target
= control target key end

     0   :  { %v88_v0 = vmov 0   ;;  %v89_v2 = vmov 2   ;;  %v90_v3 = vmov 1   ;;  %v91_v4 = vmov 3   ;;  %s132_s0 = inlined_call_operand.vmem [shape: f32[8,4], index: 0, kind: input, shape index: {}]   ;;  %s133_s1 = inlined_call_operand.vmem [shape: f32[4,4], index: 1, kind: input, shape index: {}]   ;;  %s134_s2 = inlined_call_operand.vmem [shape: f32[1,4], index: 2, kind: input, shape index: {}]   ;;  %s135_s3 = inlined_call_operand.vmem [shape: f32[8,4], index: 3, kind: input, shape index: {}]   ;;  %s136_s4 = inlined_call_operand.vmem [shape: f32[8,4], index: 4, kind: output, shape index: {}]  }
   0x1   :  { %81 = vset.pattern.permute.xlu0 %v88_v0  ;;  %v17_v1 = vld [vmem:[%s132_s0] sm:$0xff]  ;;  %83 = vset.pattern.permute.xlu1 %v89_v2  ;;  %v19_v5 = vlaneseq  ;;  %vm70_vm0 = vcmask 31744  }
   0x2   :  { %46 = vperm.xlu0 %81, %v17_v1   ;;  %58 = vperm.xlu1 %83, %v17_v1   ;;  %v18_v8 = vld [vmem:[%s133_s1] sm:$0xf] }
   0x3   :  { %v20_v6 = vshrl.u32 %v19_v5, 7  ;;  %v76_v11 = vld [vmem:[%s134_s2] ss:$0 sm:$0xff] }
   0x4   :  { %v36_v12 = vld [vmem:[%s135_s3] sm:$0xff] }
   0x5   :  { %v21_v7 = vsub.s32 0, %v20_v6  ;;  %v25_v10 = vsub.s32 1, %v20_v6  ;;  %v29_v14 = vsub.s32 2, %v20_v6  ;;  %v33_v16 = vsub.s32 3, %v20_v6 }
   0x6   :  { %82 = vset.pattern.permute.xlu0 %v90_v3  ;;  %84 = vset.pattern.permute.xlu1 %v91_v4  ;;  %v43_v17 = vadd.f32 %v76_v11, %v36_v12 }
   0x7   :  { %52 = vperm.xlu0 %82, %v17_v1   ;;  %64 = vperm.xlu1 %84, %v17_v1   ;;  %v22_v9 = vrot.slane %v18_v8, %v21_v7  ;;  %v26_v19 = vrot.slane %v18_v8, %v25_v10  ;;  %v30_v20 = vrot.slane %v18_v8, %v29_v14 }
   0x8   :  { %v34_v21 = vrot.slane %v18_v8, %v33_v16 }
   0xb   :  { %85 = vset.pattern.permute.xlu0 %v91_v4 }
  0x7d   :  { %v47_v13 = vpop.permute.xlu0 %46  ;;  %v59_v15 = vpop.permute.xlu1 %58 }
  0x7e   :  { %v49_v18 = vmul.f32 %v47_v13, %v22_v9  ;;  %v61_v26 = vmul.f32 %v59_v15, %v30_v20 }
  0x80   :  { %v50_v24 = vadd.f32 %v49_v18, %v43_v17 }
  0x82   :  { %v53_v22 = vpop.permute.xlu0 %52  ;;  %v65_v23 = vpop.permute.xlu1 %64 }
  0x83   :  { %v55_v25 = vmul.f32 %v53_v22, %v26_v19  ;;  %v67_v28 = vmul.f32 %v65_v23, %v34_v21 }
  0x85   :  { %v56_v27 = vadd.f32 %v55_v25, %v50_v24 }
  0x87   :  { %v62_v29 = vadd.f32 %v61_v26, %v56_v27 }
  0x89   :  { %v68_v30 = vadd.f32 %v67_v28, %v62_v29 }
  0x8b   :  { %86 = vtanh.f32 %v68_v30 }
  0x98   :  { %v87_v31 = vpop.eup %86 }
  0x99   :  { %71 = vst.msk [vmem:[%s136_s4] sm:$0xff] %vm70_vm0, %v87_v31 }

</bundles_post_ra>
